<compile_context>
chip_gen: v7x
topology: tpu7x:2x2x1
jax: 0.10.0
libtpu: 0.0.40
codegen_flags: <defaults>
</compile_context>

<pallas_src>
import functools

import jax
import jax.numpy as jnp
from jax import lax
from jax.experimental import pallas as pl
from jax.experimental.pallas import tpu as pltpu


def _round_up(x, m):
    return (x + m - 1) // m * m


# ----------------------------- Pallas kernel -------------------------------
def _mlp_kernel(x_ref, w1_ref, b1_ref, *rest, num_resid_layers):
    """Fused MLP forward for one [TILE_M, *] row tile.

    x / weights are bf16 MXU operands; accumulation / bias / tanh / residual
    adds are f32.
    """
    if num_resid_layers > 0:
        wh_ref, bh_ref, wf_ref, bf_ref, out_ref = rest
    else:
        wh_ref = bh_ref = None
        wf_ref, bf_ref, out_ref = rest

    # first: Linear(state -> hidden) + tanh   (x already bf16)
    h = jnp.tanh(
        jnp.dot(x_ref[...], w1_ref[...], preferred_element_type=jnp.float32)
        + b1_ref[...])

    def resid_block(hh, w, b):
        return jnp.tanh(
            jnp.dot(hh.astype(jnp.bfloat16), w,
                    preferred_element_type=jnp.float32) + b) + hh

    if num_resid_layers > 0:
        if num_resid_layers <= 4:
            # small L: static unroll (fine for vreg pressure, LLO visibility)
            for l in range(num_resid_layers):
                h = resid_block(h, wh_ref[l], bh_ref[l])
        else:
            # large L: fori_loop bounds live ranges / avoids vreg spills
            h = lax.fori_loop(
                0, num_resid_layers,
                lambda l, hh: resid_block(hh, wh_ref[l], bh_ref[l]), h)

    # final: Linear(hidden -> padded action dim), no activation; lane-dense
    # [TILE_M, N_pad] store (N_pad is a multiple of 128).
    out_ref[...] = (
        jnp.dot(h.astype(jnp.bfloat16), wf_ref[...],
                preferred_element_type=jnp.float32)
        + bf_ref[...]).astype(out_ref.dtype)


# ------------------------------- wrapper ------------------------------------
def mlp_forward(x, params, *, tile_m=512):
    """x: [batch, num_agents, state_size] float32.

    Actor  (action_size > 1): returns logits [batch, num_agents, action_size].
    Critic (action_size == 1): returns values [batch] (squeeze + mean over agents).
    """
    w1, b1, wh, bh, wf, bf = params
    B, A, S = x.shape
    H = w1.shape[1]
    N = wf.shape[1]
    L = wh.shape[0]
    M = B * A

    f32, bf16 = jnp.float32, jnp.bfloat16

    H_pad = _round_up(H, 128)            # lane / MXU aligned hidden dim
    N_pad = _round_up(N, 128)            # lane-dense output slab

    # Balance the row tiles: fix the tile count first, then size TILE_M so the
    # last tile carries the least padding (sublane-aligned to 8).
    num_tiles = max(1, pl.cdiv(M, tile_m))
    TILE_M = _round_up(pl.cdiv(M, num_tiles), 8)
    M_pad = num_tiles * TILE_M

    # ---- pad + cast params (weights -> bf16 MXU operands, biases f32) ----
    w1p = jnp.zeros((S, H_pad), bf16).at[:, :H].set(w1.astype(bf16))
    b1p = jnp.zeros((1, H_pad), f32).at[:, :H].set(b1.astype(f32))
    wfp = jnp.zeros((H_pad, N_pad), bf16).at[:H, :N].set(wf.astype(bf16))
    bfp = jnp.zeros((1, N_pad), f32).at[:, :N].set(bf.astype(f32))

    # x pre-cast to bf16: MXU operand only, halves HBM read traffic.
    x2 = x.reshape(M, S).astype(bf16)
    if M_pad != M:
        x2 = jnp.zeros((M_pad, S), bf16).at[:M].set(x2)

    def resident(shape):                 # full-array block, stays in VMEM
        zeros = (0,) * len(shape)
        return pl.BlockSpec(shape, lambda i: zeros)

    in_specs = [
        pl.BlockSpec((TILE_M, S), lambda i: (i, 0)),   # pipelined x row tiles
        resident((S, H_pad)),
        resident((1, H_pad)),
    ]
    args = [x2, w1p, b1p]

    wt_bytes = (w1p.size + wfp.size) * 2
    bias_bytes = (b1p.size + bfp.size) * 4
    if L > 0:
        whp = jnp.zeros((L, H_pad, H_pad), bf16).at[:, :H, :H].set(wh.astype(bf16))
        bhp = jnp.zeros((L, 1, H_pad), f32).at[:, :, :H].set(bh.astype(f32))
        in_specs += [resident((L, H_pad, H_pad)), resident((L, 1, H_pad))]
        args += [whp, bhp]
        wt_bytes += whp.size * 2
        bias_bytes += bhp.size * 4

    in_specs += [resident((H_pad, N_pad)), resident((1, N_pad))]
    args += [wfp, bfp]

    # VMEM budget: 2x resident weights (buffering) + double-buffered x (bf16) /
    # out (f32) row tiles + f32 activation temps.  Raised above the 16/32 MiB
    # scoped defaults, capped below v7x's 64 MiB physical.
    # TODO(synk): if L * H_pad^2 no longer fits resident, stream hidden-layer
    # weights with pltpu.emit_pipeline instead of raising this limit.
    io_bytes = 2 * TILE_M * (S * 2 + N_pad * 4)
    act_bytes = 4 * TILE_M * H_pad * 4
    needed = 2 * (wt_bytes + bias_bytes) + io_bytes + act_bytes
    vmem_limit = int(min(max(needed, 32 << 20), 56 << 20))

    kernel = functools.partial(_mlp_kernel, num_resid_layers=L)
    out2 = pl.pallas_call(
        kernel,
        out_shape=jax.ShapeDtypeStruct((M_pad, N_pad), f32),
        grid=(num_tiles,),
        in_specs=in_specs,
        out_specs=pl.BlockSpec((TILE_M, N_pad), lambda i: (i, 0)),
        compiler_params=pltpu.CompilerParams(
            dimension_semantics=("parallel",),     # megacore split on v7x
            vmem_limit_bytes=vmem_limit),
    )(*args)

    out = out2[:M, :N].reshape(B, A, N)
    if N > 1:
        # TODO(synk): torch.distributions.Categorical has no Pallas
        # equivalent; we return the logits that parameterize it.
        return out
    # critic: squeeze(-1) then mean over agents (cheap glue reduction).
    return out.reshape(B, A).mean(axis=-1)


# --------------------------- parameter creation ------------------------------
def init_params(key, state_size, action_size, hidden_size, num_layers):
    """Deterministic init mirroring the PyTorch module's shapes.

    first / hidden layers: PyTorch default Linear init  U(-1/sqrt(in), 1/sqrt(in)).
    final layer: orthogonal init (columns of Q) scaled by std
                 (0.01 if actor, 1.0 if critic), bias = 0.
    """
    assert num_layers >= 2
    n_resid = num_layers - 2
    keys = jax.random.split(key, 4 + 2 * max(n_resid, 1))

    def uniform_linear(k, fan_in, fan_out):
        kw, kb = jax.random.split(k)
        bound = 1.0 / jnp.sqrt(fan_in)
        w = jax.random.uniform(kw, (fan_in, fan_out), jnp.float32, -bound, bound)
        b = jax.random.uniform(kb, (1, fan_out), jnp.float32, -bound, bound)
        return w, b

    w1, b1 = uniform_linear(keys[0], state_size, hidden_size)

    wh_list, bh_list = [], []
    for i in range(n_resid):
        w, b = uniform_linear(keys[1 + i], hidden_size, hidden_size)
        wh_list.append(w)
        bh_list.append(b)
    if n_resid > 0:
        wh = jnp.stack(wh_list)                     # [L, H, H]
        bh = jnp.stack(bh_list)                     # [L, 1, H]
    else:
        wh = jnp.zeros((0, hidden_size, hidden_size), jnp.float32)
        bh = jnp.zeros((0, 1, hidden_size), jnp.float32)

    std = 0.01 if action_size > 1 else 1.0
    g = jax.random.normal(keys[-1], (hidden_size, max(hidden_size, action_size)),
                          jnp.float32)
    q, _ = jnp.linalg.qr(g)
    wf = std * q[:, :action_size]                   # [H, action_size]
    bf = jnp.zeros((1, action_size), jnp.float32)

    return (w1, b1, wh, bh, wf, bf)


# -------------------------- pure-JAX reference -------------------------------
def mlp_reference(x, params, dot_dtype=jnp.bfloat16):
    """Reference with matching bf16-operand / f32-accumulate matmuls."""
    w1, b1, wh, bh, wf, bf = params

    def dot(a, w):
        return jnp.dot(a.astype(dot_dtype), w.astype(dot_dtype),
                       preferred_element_type=jnp.float32)

    h = jnp.tanh(dot(x, w1) + b1)
    for l in range(wh.shape[0]):
        h = jnp.tanh(dot(h, wh[l]) + bh[l]) + h
    out = dot(h, wf) + bf
    if wf.shape[1] > 1:
        return out
    return out[..., 0].mean(axis=-1)


# ---------------------------------- demo -------------------------------------
if __name__ == "__main__":
    key = jax.random.PRNGKey(0)

    configs = [
        # (batch, agents, state, action, hidden, num_layers)
        (2, 4, 8, 6, 32, 4),   # actor with residual hidden blocks
        (2, 4, 8, 1, 32, 3),   # critic (value head, mean over agents)
        (2, 4, 8, 6, 32, 2),   # actor with no residual hidden blocks (L = 0)
    ]
    for cfg_i, (B, A, S, Na, H, NL) in enumerate(configs):
        k_x, k_p, key = jax.random.split(key, 3)
        x = jax.random.normal(k_x, (B, A, S), jnp.float32)
        params = init_params(k_p, S, Na, H, NL)

        out = jax.block_until_ready(mlp_forward(x, params))
        ref = mlp_reference(x, params)

        expected_shape = (B, A, Na) if Na > 1 else (B,)
        assert out.shape == expected_shape, (cfg_i, out.shape, expected_shape)
        assert jnp.allclose(out, ref, atol=1e-3, rtol=1e-3), (
            f"config {cfg_i}: max err {jnp.max(jnp.abs(out - ref)):.3e}")

    print("KERNEL_OK")
</pallas_src>

<mosaic_0001>
module attributes {stable_mosaic.version = 11 : i64} {
  func.func @_mlp_kernel(%arg0: i32, %arg1: memref<8x8xbf16, #tpu.memory_space<vmem>>, %arg2: memref<8x128xbf16, #tpu.memory_space<vmem>>, %arg3: memref<1x128xf32, #tpu.memory_space<vmem>>, %arg4: memref<2x128x128xbf16, #tpu.memory_space<vmem>>, %arg5: memref<2x1x128xf32, #tpu.memory_space<vmem>>, %arg6: memref<128x128xbf16, #tpu.memory_space<vmem>>, %arg7: memref<1x128xf32, #tpu.memory_space<vmem>>, %arg8: memref<8x128xf32, #tpu.memory_space<vmem>>) attributes {dimension_semantics = [#tpu.dimension_semantics<parallel>], iteration_bounds = array<i64: 1>, scalar_prefetch = 0 : i64, scratch_operands = 0 : i64, tpu.core_type = #tpu.core_type<tc>, window_params = [{transform_indices = @transform_0, window_bounds = array<i64: 8, 8>}, {pipeline_mode = #tpu.pipeline_mode<synchronous>, transform_indices = @transform_1, window_bounds = array<i64: 8, 128>}, {pipeline_mode = #tpu.pipeline_mode<synchronous>, transform_indices = @transform_2, window_bounds = array<i64: 1, 128>}, {pipeline_mode = #tpu.pipeline_mode<synchronous>, transform_indices = @transform_3, window_bounds = array<i64: 2, 128, 128>}, {pipeline_mode = #tpu.pipeline_mode<synchronous>, transform_indices = @transform_4, window_bounds = array<i64: 2, 1, 128>}, {pipeline_mode = #tpu.pipeline_mode<synchronous>, transform_indices = @transform_5, window_bounds = array<i64: 128, 128>}, {pipeline_mode = #tpu.pipeline_mode<synchronous>, transform_indices = @transform_6, window_bounds = array<i64: 1, 128>}, {transform_indices = @transform_7, window_bounds = array<i64: 8, 128>}]} {
    %c0 = arith.constant 0 : index
    %c0_0 = arith.constant 0 : index
    %0 = vector.load %arg1[%c0, %c0_0] : memref<8x8xbf16, #tpu.memory_space<vmem>>, vector<8x8xbf16>
    %c0_1 = arith.constant 0 : index
    %c0_2 = arith.constant 0 : index
    %1 = vector.load %arg2[%c0_1, %c0_2] : memref<8x128xbf16, #tpu.memory_space<vmem>>, vector<8x128xbf16>
    %cst = arith.constant dense<0.000000e+00> : vector<8x128xf32>
    %2 = tpu.matmul %0, %1, %cst {dimension_numbers = #tpu.dot_dimension_numbers<[1], [0], [0], [1], [0, 0, 1, 1], [], []>} : vector<8x8xbf16>, vector<8x128xbf16>, vector<8x128xf32> -> vector<8x128xf32>
    %c0_3 = arith.constant 0 : index
    %c0_4 = arith.constant 0 : index
    %3 = vector.load %arg3[%c0_3, %c0_4] : memref<1x128xf32, #tpu.memory_space<vmem>>, vector<1x128xf32>
    %4 = vector.broadcast %3 : vector<1x128xf32> to vector<8x128xf32>
    %5 = arith.addf %2, %4 : vector<8x128xf32>
    %6 = math.tanh %5 : vector<8x128xf32>
    %c0_5 = arith.constant 0 : index
    %c0_6 = arith.constant 0 : index
    %c0_7 = arith.constant 0 : index
    %7 = vector.load %arg4[%c0_5, %c0_6, %c0_7] : memref<2x128x128xbf16, #tpu.memory_space<vmem>>, vector<1x128x128xbf16>
    %8 = vector.shape_cast %7 : vector<1x128x128xbf16> to vector<128x128xbf16>
    %c0_8 = arith.constant 0 : index
    %c0_9 = arith.constant 0 : index
    %c0_10 = arith.constant 0 : index
    %9 = vector.load %arg5[%c0_8, %c0_9, %c0_10] : memref<2x1x128xf32, #tpu.memory_space<vmem>>, vector<1x1x128xf32>
    %10 = vector.shape_cast %9 : vector<1x1x128xf32> to vector<1x128xf32>
    %11 = arith.truncf %6 : vector<8x128xf32> to vector<8x128xbf16>
    %cst_11 = arith.constant dense<0.000000e+00> : vector<8x128xf32>
    %12 = tpu.matmul %11, %8, %cst_11 {dimension_numbers = #tpu.dot_dimension_numbers<[1], [0], [0], [1], [0, 0, 1, 1], [], []>} : vector<8x128xbf16>, vector<128x128xbf16>, vector<8x128xf32> -> vector<8x128xf32>
    %13 = vector.broadcast %10 : vector<1x128xf32> to vector<8x128xf32>
    %14 = arith.addf %12, %13 : vector<8x128xf32>
    %15 = math.tanh %14 : vector<8x128xf32>
    %16 = arith.addf %15, %6 : vector<8x128xf32>
    %c1 = arith.constant 1 : index
    %c0_12 = arith.constant 0 : index
    %c0_13 = arith.constant 0 : index
    %17 = vector.load %arg4[%c1, %c0_12, %c0_13] : memref<2x128x128xbf16, #tpu.memory_space<vmem>>, vector<1x128x128xbf16>
    %18 = vector.shape_cast %17 : vector<1x128x128xbf16> to vector<128x128xbf16>
    %c1_14 = arith.constant 1 : index
    %c0_15 = arith.constant 0 : index
    %c0_16 = arith.constant 0 : index
    %19 = vector.load %arg5[%c1_14, %c0_15, %c0_16] : memref<2x1x128xf32, #tpu.memory_space<vmem>>, vector<1x1x128xf32>
    %20 = vector.shape_cast %19 : vector<1x1x128xf32> to vector<1x128xf32>
    %21 = arith.truncf %16 : vector<8x128xf32> to vector<8x128xbf16>
    %cst_17 = arith.constant dense<0.000000e+00> : vector<8x128xf32>
    %22 = tpu.matmul %21, %18, %cst_17 {dimension_numbers = #tpu.dot_dimension_numbers<[1], [0], [0], [1], [0, 0, 1, 1], [], []>} : vector<8x128xbf16>, vector<128x128xbf16>, vector<8x128xf32> -> vector<8x128xf32>
    %23 = vector.broadcast %20 : vector<1x128xf32> to vector<8x128xf32>
    %24 = arith.addf %22, %23 : vector<8x128xf32>
    %25 = math.tanh %24 : vector<8x128xf32>
    %26 = arith.addf %25, %16 : vector<8x128xf32>
    %27 = arith.truncf %26 : vector<8x128xf32> to vector<8x128xbf16>
    %c0_18 = arith.constant 0 : index
    %c0_19 = arith.constant 0 : index
    %28 = vector.load %arg6[%c0_18, %c0_19] : memref<128x128xbf16, #tpu.memory_space<vmem>>, vector<128x128xbf16>
    %cst_20 = arith.constant dense<0.000000e+00> : vector<8x128xf32>
    %29 = tpu.matmul %27, %28, %cst_20 {dimension_numbers = #tpu.dot_dimension_numbers<[1], [0], [0], [1], [0, 0, 1, 1], [], []>} : vector<8x128xbf16>, vector<128x128xbf16>, vector<8x128xf32> -> vector<8x128xf32>
    %c0_21 = arith.constant 0 : index
    %c0_22 = arith.constant 0 : index
    %30 = vector.load %arg7[%c0_21, %c0_22] : memref<1x128xf32, #tpu.memory_space<vmem>>, vector<1x128xf32>
    %31 = vector.broadcast %30 : vector<1x128xf32> to vector<8x128xf32>
    %32 = arith.addf %29, %31 : vector<8x128xf32>
    %c0_23 = arith.constant 0 : index
    %c0_24 = arith.constant 0 : index
    %33 = vector.load %arg8[%c0_23, %c0_24] : memref<8x128xf32, #tpu.memory_space<vmem>>, vector<8x128xf32>
    tpu.vector_store %arg8[%c0_23, %c0_24], %32 {strides = array<i32>} : memref<8x128xf32, #tpu.memory_space<vmem>>, vector<8x128xf32>,
    return
  }
  func.func @transform_0(%arg0: i32) -> (i32, i32) {
    %c0_i32 = arith.constant 0 : i32
    %c0_i32_0 = arith.constant 0 : i32
    return %arg0, %c0_i32 : i32, i32
  }
  func.func @transform_1(%arg0: i32) -> (i32, i32) {
    %c0_i32 = arith.constant 0 : i32
    %c0_i32_0 = arith.constant 0 : i32
    %c0_i32_1 = arith.constant 0 : i32
    return %c0_i32, %c0_i32_0 : i32, i32
  }
  func.func @transform_2(%arg0: i32) -> (i32, i32) {
    %c0_i32 = arith.constant 0 : i32
    %c0_i32_0 = arith.constant 0 : i32
    %c0_i32_1 = arith.constant 0 : i32
    return %c0_i32, %c0_i32_0 : i32, i32
  }
  func.func @transform_3(%arg0: i32) -> (i32, i32, i32) {
    %c0_i32 = arith.constant 0 : i32
    %c0_i32_0 = arith.constant 0 : i32
    %c0_i32_1 = arith.constant 0 : i32
    %c0_i32_2 = arith.constant 0 : i32
    return %c0_i32, %c0_i32_0, %c0_i32_1 : i32, i32, i32
  }
  func.func @transform_4(%arg0: i32) -> (i32, i32, i32) {
    %c0_i32 = arith.constant 0 : i32
    %c0_i32_0 = arith.constant 0 : i32
    %c0_i32_1 = arith.constant 0 : i32
    %c0_i32_2 = arith.constant 0 : i32
    return %c0_i32, %c0_i32_0, %c0_i32_1 : i32, i32, i32
  }
  func.func @transform_5(%arg0: i32) -> (i32, i32) {
    %c0_i32 = arith.constant 0 : i32
    %c0_i32_0 = arith.constant 0 : i32
    %c0_i32_1 = arith.constant 0 : i32
    return %c0_i32, %c0_i32_0 : i32, i32
  }
  func.func @transform_6(%arg0: i32) -> (i32, i32) {
    %c0_i32 = arith.constant 0 : i32
    %c0_i32_0 = arith.constant 0 : i32
    %c0_i32_1 = arith.constant 0 : i32
    return %c0_i32, %c0_i32_0 : i32, i32
  }
  func.func @transform_7(%arg0: i32) -> (i32, i32) {
    %c0_i32 = arith.constant 0 : i32
    %c0_i32_0 = arith.constant 0 : i32
    return %arg0, %c0_i32 : i32, i32
  }
}

</mosaic_0001>

<bundles_post_ra>
// kernel: tpu_custom_call.1
= control target key start
LH: loop header
LB: loop body
LE: loop exit
PB: predicated region body
PF: predicated region fallthrough
CT: control target
= control target key end

     0   :  { %12 = vsyncpa [#allocation3], 0  ;;  %s933_s0 = inlined_call_operand.hbm [shape: bf16[8,8], index: 0, kind: input, shape index: {}]   ;;  %s934_s1 = inlined_call_operand.hbm [shape: bf16[8,128], index: 1, kind: input, shape index: {}]   ;;  %s935_s2 = inlined_call_operand.vmem [shape: f32[1,128], index: 2, kind: input, shape index: {}]   ;;  %s936_s3 = inlined_call_operand.hbm [shape: bf16[2,128,128], index: 3, kind: input, shape index: {}]   ;;  %s937_s4 = inlined_call_operand.vmem [shape: f32[2,1,128], index: 4, kind: input, shape index: {}]   ;;  %s938_s5 = inlined_call_operand.hbm [shape: bf16[128,128], index: 5, kind: input, shape index: {}]   ;;  %s939_s6 = inlined_call_operand.vmem [shape: f32[1,128], index: 6, kind: input, shape index: {}]   ;;  %s940_s7 = inlined_call_operand.hbm [shape: f32[8,128], index: 7, kind: output, shape index: {}]  }
   0x1   :  { %13 = vsyncpa [#allocation6], 0 }
   0x2   :  { %14 = vsyncpa [#allocation9], 0 }
   0x3   :  { %15 = vsyncpa [#allocation4], 0  ;;  %s779_s24 = smov [#allocation5]   ;;  %s780_s26 = smov [#allocation2]  }
   0x4   :  { %s32_s25 = sshll.u32 %s779_s24, 4  ;;  %s22_s27 = sshll.u32 %s780_s26, 4  ;;  %s33_s25 = int_to_ptr.vmem [resolvable:$true] %s32_s25  ;;  %s23_s27 = int_to_ptr.vmem [resolvable:$true] %s22_s27 }
   0x5   :  { %s661_s30 = scalar_lea.hbm %s934_s1, 64 }
   0x6   :  { %p662_p0 = scmp.ne.s32.totalorder %s934_s1, %s661_s30  ;;  %p665_p1 = scmp.lt.u32.totalorder %s661_s30, %s934_s1 }
   0x8   :  { %p667_p2 = pnand %p665_p1, %p662_p0 }
   0xa   :  { %670 = shalt.err (!%p667_p2)
}
   0xb   :  { %s671_s12 = scalar_lea.vmem %s33_s25, 64  ;;  %p676_p4 = scmp.lt.s32.totalorder %s33_s25, %s33_s25 }
   0xc   :  { %p672_p3 = scmp.ne.s32.totalorder %s33_s25, %s671_s12  ;;  %p677_p5 = scmp.lt.s32.totalorder %s671_s12, %s671_s12 }
   0xe   :  { %p678_p6 = por %p677_p5, %p676_p4 }
  0x10   :  { %p679_p7 = pnand %p678_p6, %p672_p3 }
  0x12   :  { %682 = shalt.err (!%p679_p7)
}
  0x13   :  { %35 = dma.hbm_to_vmem [thread:$0]  %s934_s1, 64, %s33_s25, [#allocation6]  }
  0x14   :  { %s683_s17 = scalar_lea.hbm %s933_s0, 64 }
  0x15   :  { %p684_p8 = scmp.ne.s32.totalorder %s933_s0, %s683_s17  ;;  %p687_p9 = scmp.lt.u32.totalorder %s683_s17, %s933_s0 }
  0x17   :  { %p689_p10 = pnand %p687_p9, %p684_p8 }
  0x19   :  { %692 = shalt.err (!%p689_p10)
}
  0x1a   :  { %s693_s22 = scalar_lea.vmem %s23_s27, 64  ;;  %p698_p12 = scmp.lt.s32.totalorder %s23_s27, %s23_s27 }
  0x1b   :  { %p694_p11 = scmp.ne.s32.totalorder %s23_s27, %s693_s22  ;;  %p699_p13 = scmp.lt.s32.totalorder %s693_s22, %s693_s22 }
  0x1d   :  { %p700_p0 = por %p699_p13, %p698_p12 }
  0x1f   :  { %p701_p1 = pnand %p700_p0, %p694_p11 }
  0x21   :  { %704 = shalt.err (!%p701_p1)
}
  0x22   :  { %25 = dma.hbm_to_vmem [thread:$0]  %s933_s0, 64, %s23_s27, [#allocation3]  }
  0x23   :  { %s781_s24 = smov [#allocation7]   ;;  %s705_s29 = scalar_lea.hbm %s936_s3, 2048 }
  0x24   :  { %s43_s25 = sshll.u32 %s781_s24, 4  ;;  %p706_p2 = scmp.ne.s32.totalorder %s936_s3, %s705_s29  ;;  %s44_s25 = int_to_ptr.vmem [resolvable:$true] %s43_s25 }
  0x25   :  { %p709_p3 = scmp.lt.u32.totalorder %s705_s29, %s936_s3 }
  0x27   :  { %p711_p4 = pnand %p709_p3, %p706_p2 }
  0x29   :  { %714 = shalt.err (!%p711_p4)
}
  0x2a   :  { %s715_s11 = scalar_lea.vmem %s44_s25, 2048  ;;  %p720_p6 = scmp.lt.s32.totalorder %s44_s25, %s44_s25 }
  0x2b   :  { %p716_p5 = scmp.ne.s32.totalorder %s44_s25, %s715_s11  ;;  %p721_p7 = scmp.lt.s32.totalorder %s715_s11, %s715_s11 }
  0x2d   :  { %p722_p8 = por %p721_p7, %p720_p6 }
  0x2f   :  { %p723_p9 = pnand %p722_p8, %p716_p5 }
  0x31   :  { %726 = shalt.err (!%p723_p9)
}
  0x32   :  { %s782_s0 = smov 64   ;;  %s783_s27 = smov 4  }
  0x33   :  { %49 = dma.hbm_to_vmem [thread:$0]  %s936_s3, 2048, %s44_s25, [#allocation6], %s782_s0, %s782_s0, %s783_s27  }
  0x34   :  { %s784_s14 = smov [#allocation8]   ;;  %s727_s18 = scalar_lea.hbm %s938_s5, 1024 }
  0x35   :  { %s57_s15 = sshll.u32 %s784_s14, 4  ;;  %p728_p10 = scmp.ne.s32.totalorder %s938_s5, %s727_s18  ;;  %s58_s15 = int_to_ptr.vmem [resolvable:$true] %s57_s15 }
  0x36   :  { %p731_p11 = scmp.lt.u32.totalorder %s727_s18, %s938_s5 }
  0x38   :  { %p733_p12 = pnand %p731_p11, %p728_p10 }
  0x3a   :  { %736 = shalt.err (!%p733_p12)
}
  0x3b   :  { %s737_s1 = scalar_lea.vmem %s58_s15, 1024  ;;  %p742_p0 = scmp.lt.s32.totalorder %s58_s15, %s58_s15 }
  0x3c   :  { %p738_p13 = scmp.ne.s32.totalorder %s58_s15, %s737_s1  ;;  %p743_p1 = scmp.lt.s32.totalorder %s737_s1, %s737_s1 }
  0x3e   :  { %p744_p2 = por %p743_p1, %p742_p0 }
  0x40   :  { %p745_p3 = pnand %p744_p2, %p738_p13 }
  0x42   :  { %748 = shalt.err (!%p745_p3)
}
  0x43   :  { %63 = dma.hbm_to_vmem [thread:$0]  %s938_s5, 1024, %s58_s15, [#allocation9], %s782_s0, %s782_s0, %s783_s27  }
  0x44   :  { %771 = dma.done.wait [#allocation3], 64  }
  0x45   :  { %772 = vsyncadd [#allocation3], 4294967232 }
  0x46   :  { %773 = dma.done.wait [#allocation6], 2112  }
  0x47   :  { %774 = vsyncadd [#allocation6], 4294965184 }
  0x48   :  { %775 = dma.done.wait [#allocation9], 1024  }
  0x49   :  { %776 = vsyncadd [#allocation9], 4294966272  ;;  %v785_v0 = vmov 0.0   ;;  %vm786_vm0 = vmmov 0   ;;  %vm92_vm1 = vcmask 1043456   ;;  %vm88_vm2 = vcmask 64512  }
  0x4a   :  { %556 = vmatprep.subr.bf16.mxu0 %v785_v0  ;;  %558 = vmatprep.mubr.msk.bf16.mxu0 %vm786_vm0, %v785_v0  ;;  %v80_v1 = vld [vmem:[#allocation5] sm:$0xf]  ;;  %v631_v3 = vld [vmem:[#allocation7] sm:$0xff]   ;;  %v79_v4 = vld [vmem:[#allocation2] sm:$0xf]  ;;  %s787_s8 = smov [#allocation10]  }
  0x4b   :  { %562 = vmatprep.subr.bf16.mxu1 %v785_v0  ;;  %578 = vmatprep.mubr.msk.bf16.mxu1 %vm786_vm0, %v785_v0  ;;  %v94_v2 = vsel %vm92_vm1, %v80_v1, 0  ;;  %v632_v5 = vld [vmem:[#allocation7 + $0x8] sm:$0xff]   ;;  %v633_v6 = vld [vmem:[#allocation7 + $0x10] sm:$0xff]   ;;  %v634_v7 = vld [vmem:[#allocation7 + $0x18] sm:$0xff]   ;;  %s486_s9 = sshll.u32 %s787_s8, 4  ;;  %s487_s9 = int_to_ptr.vmem [resolvable:$true] %s486_s9 }
  0x4c   :  { %557 = vmatpush3.bf16.msra.mxu0 %v94_v2  ;;  %563 = vmatpush3.bf16.msra.mxu1 %v631_v3  ;;  %v635_v8 = vld [vmem:[#allocation7 + $0x20] sm:$0xff]   ;;  %v636_v9 = vld [vmem:[#allocation7 + $0x28] sm:$0xff]   ;;  %v637_v10 = vld [vmem:[#allocation7 + $0x30] sm:$0xff]   ;;  %p754_p5 = scmp.lt.s32.totalorder %s487_s9, %s487_s9 }
  0x4d   :  { %582 = vmatprep.subr.bf16.mxu0 %v785_v0  ;;  %564 = vmatprep.subr.bf16.mxu1 %v785_v0  ;;  %v638_v11 = vld [vmem:[#allocation7 + $0x38] sm:$0xff]   ;;  %v639_v12 = vld [vmem:[#allocation7 + $0x40] sm:$0xff]   ;;  %v640_v13 = vld [vmem:[#allocation7 + $0x48] sm:$0xff]  }
  0x4e   :  { %v641_v14 = vld [vmem:[#allocation7 + $0x50] sm:$0xff]   ;;  %v642_v15 = vld [vmem:[#allocation7 + $0x58] sm:$0xff]   ;;  %v643_v24 = vld [vmem:[#allocation7 + $0x60] sm:$0xff]  }
  0x4f   :  { %559 = vmatmul.mubr.msk.bf16.vlgmr.msra.gmra.mrb[0].mxu0 %vm88_vm2, %v79_v4  ;;  %v497_v16 = vld [vmem:[%s935_s2] ss:$0 sm:$0xff]  ;;  %v644_v25 = vld [vmem:[#allocation7 + $0x68] sm:$0xff]   ;;  %v645_v26 = vld [vmem:[#allocation7 + $0x70] sm:$0xff]  }
  0x50   :  { %598 = vmatprep.mubr.msk.bf16.mxu0 %vm786_vm0, %v785_v0  ;;  %565 = vmatpush3.bf16.msra.mxu1 %v632_v5  ;;  %v646_v27 = vld [vmem:[#allocation7 + $0x78] sm:$0xff]   ;;  %v647_v28 = vld [vmem:[#allocation8] sm:$0xff]   ;;  %v648_v29 = vld [vmem:[#allocation8 + $0x8] sm:$0xff]  }
  0x51   :  { %566 = vmatprep.subr.bf16.mxu1 %v785_v0  ;;  %583 = vmatpush3.bf16.msra.mxu0 %v639_v12  ;;  %v649_v30 = vld [vmem:[#allocation8 + $0x10] sm:$0xff]   ;;  %v650_v31 = vld [vmem:[#allocation8 + $0x18] sm:$0xff]   ;;  %v651_v41 = vld [vmem:[#allocation8 + $0x20] sm:$0xff]  }
  0x52   :  { %584 = vmatprep.subr.bf16.mxu0 %v785_v0  ;;  %v499_v32 = vld [vmem:[%s937_s4] ss:$0 sm:$0xff]  ;;  %v652_v42 = vld [vmem:[#allocation8 + $0x28] sm:$0xff]   ;;  %v653_v43 = vld [vmem:[#allocation8 + $0x30] sm:$0xff]  }
  0x53   :  { %v654_v44 = vld [vmem:[#allocation8 + $0x38] sm:$0xff]  }
  0x54   :  { %567 = vmatpush3.bf16.msra.mxu1 %v633_v6  ;;  %v509_v45 = vld [vmem:[%s937_s4 + $0x1] ss:$0 sm:$0xff]  ;;  %v518_v54 = vld [vmem:[%s939_s6] ss:$0 sm:$0xff]  ;;  %s749_s4 = scalar_lea.vmem %s487_s9, 128 }
  0x55   :  { %568 = vmatprep.subr.bf16.mxu1 %v785_v0  ;;  %585 = vmatpush3.bf16.msra.mxu0 %v640_v13  ;;  %p750_p4 = scmp.ne.s32.totalorder %s487_s9, %s749_s4  ;;  %p755_p6 = scmp.lt.s32.totalorder %s749_s4, %s749_s4 }
  0x56   :  { %586 = vmatprep.subr.bf16.mxu0 %v785_v0 }
  0x57   :  { %p756_p7 = por %p755_p6, %p754_p5 }
  0x58   :  { %569 = vmatpush3.bf16.msra.mxu1 %v634_v7 }
  0x59   :  { %570 = vmatprep.subr.bf16.mxu1 %v785_v0  ;;  %587 = vmatpush3.bf16.msra.mxu0 %v641_v14  ;;  %p757_p8 = pnand %p756_p7, %p750_p4 }
  0x5a   :  { %588 = vmatprep.subr.bf16.mxu0 %v785_v0 }
  0x5c   :  { %571 = vmatpush3.bf16.msra.mxu1 %v635_v8 }
  0x5d   :  { %572 = vmatprep.subr.bf16.mxu1 %v785_v0  ;;  %589 = vmatpush3.bf16.msra.mxu0 %v642_v15 }
  0x5e   :  { %590 = vmatprep.subr.bf16.mxu0 %v785_v0 }
  0x60   :  { %573 = vmatpush3.bf16.msra.mxu1 %v636_v9 }
  0x61   :  { %574 = vmatprep.subr.bf16.mxu1 %v785_v0  ;;  %591 = vmatpush3.bf16.msra.mxu0 %v643_v24 }
  0x62   :  { %592 = vmatprep.subr.bf16.mxu0 %v785_v0 }
  0x64   :  { %575 = vmatpush3.bf16.msra.mxu1 %v637_v10 }
  0x65   :  { %576 = vmatprep.subr.bf16.mxu1 %v785_v0  ;;  %593 = vmatpush3.bf16.msra.mxu0 %v644_v25 }
  0x66   :  { %594 = vmatprep.subr.bf16.mxu0 %v785_v0 }
  0x68   :  { %577 = vmatpush3.bf16.msra.mxu1 %v638_v11 }
  0x69   :  { %602 = vmatprep.subr.bf16.mxu1 %v785_v0  ;;  %595 = vmatpush3.bf16.msra.mxu0 %v645_v26 }
  0x6a   :  { %596 = vmatprep.subr.bf16.mxu0 %v785_v0 }
  0x6d   :  { %597 = vmatpush3.bf16.msra.mxu0 %v646_v27 }
 0x122   :  { %v130_v17 = vpop.f32.mrb[0].mxu0 }
 0x123   :  { %v131_v18 = vadd.f32 %v497_v16, %v130_v17  ;;  %v560_v19 = vpop.f32.mrb[1].mxu0 }
 0x124   :  { %v133_v20 = vpop.f32.mrb[2].mxu0 }
 0x125   :  { %655 = vtanh.f32 %v131_v18  ;;  %v561_v21 = vpop.f32.mrb[3].mxu0 }
 0x12f   :  { %v656_v22 = vpop.eup %655 }
 0x130   :  { %v154_v23 = vpack.c.bf16 %v656_v22, %v656_v22 }
 0x132   :  { %579 = vmatmul.mubr.bf16.vlgmr.msra.gmra.mrb[0].mxu1 %v154_v23 }
 0x133   :  { %618 = vmatprep.mubr.msk.bf16.mxu1 %vm786_vm0, %v785_v0  ;;  %603 = vmatpush3.bf16.msra.mxu1 %v647_v28 }
 0x134   :  { %604 = vmatprep.subr.bf16.mxu1 %v785_v0 }
 0x137   :  { %605 = vmatpush3.bf16.msra.mxu1 %v648_v29 }
 0x138   :  { %606 = vmatprep.subr.bf16.mxu1 %v785_v0 }
 0x13b   :  { %607 = vmatpush3.bf16.msra.mxu1 %v649_v30 }
 0x13c   :  { %608 = vmatprep.subr.bf16.mxu1 %v785_v0 }
 0x13f   :  { %609 = vmatpush3.bf16.msra.mxu1 %v650_v31 }
 0x140   :  { %610 = vmatprep.subr.bf16.mxu1 %v785_v0 }
 0x143   :  { %611 = vmatpush3.bf16.msra.mxu1 %v651_v41 }
 0x144   :  { %612 = vmatprep.subr.bf16.mxu1 %v785_v0 }
 0x147   :  { %613 = vmatpush3.bf16.msra.mxu1 %v652_v42 }
 0x148   :  { %614 = vmatprep.subr.bf16.mxu1 %v785_v0 }
 0x14b   :  { %615 = vmatpush3.bf16.msra.mxu1 %v653_v43 }
 0x14c   :  { %616 = vmatprep.subr.bf16.mxu1 %v785_v0 }
 0x14f   :  { %617 = vmatpush3.bf16.msra.mxu1 %v654_v44 }
 0x205   :  { %v243_v33 = vpop.f32.mrb[0].mxu1 }
 0x206   :  { %v244_v34 = vadd.f32 %v499_v32, %v243_v33  ;;  %v580_v35 = vpop.f32.mrb[1].mxu1 }
 0x207   :  { %v246_v36 = vpop.f32.mrb[2].mxu1 }
 0x208   :  { %657 = vtanh.f32 %v244_v34  ;;  %v581_v37 = vpop.f32.mrb[3].mxu1 }
 0x212   :  { %v658_v38 = vpop.eup %657 }
 0x213   :  { %v250_v39 = vadd.f32 %v658_v38, %v656_v22 }
 0x215   :  { %v270_v40 = vpack.c.bf16 %v250_v39, %v250_v39 }
 0x217   :  { %599 = vmatmul.mubr.bf16.vlgmr.msra.gmra.mrb[4].mxu0 %v270_v40 }
 0x2ea   :  { %v359_v46 = vpop.f32.mrb[4].mxu0 }
 0x2eb   :  { %v360_v47 = vadd.f32 %v509_v45, %v359_v46  ;;  %v600_v48 = vpop.f32.mrb[5].mxu0 }
 0x2ec   :  { %v362_v49 = vpop.f32.mrb[6].mxu0 }
 0x2ed   :  { %659 = vtanh.f32 %v360_v47  ;;  %v601_v50 = vpop.f32.mrb[7].mxu0 }
 0x2f7   :  { %v660_v51 = vpop.eup %659 }
 0x2f8   :  { %v366_v52 = vadd.f32 %v660_v51, %v250_v39 }
 0x2fa   :  { %v367_v53 = vpack.c.bf16 %v366_v52, %v366_v52 }
 0x2fc   :  { %619 = vmatmul.mubr.bf16.vlgmr.msra.gmra.mrb[4].mxu1 %v367_v53 }
 0x3cf   :  { %v473_v55 = vpop.f32.mrb[4].mxu1 }
 0x3d0   :  { %v474_v56 = vadd.f32 %v518_v54, %v473_v55  ;;  %v620_v57 = vpop.f32.mrb[5].mxu1 }
 0x3d1   :  { %v476_v58 = vpop.f32.mrb[6].mxu1 }
 0x3d2   :  { %479 = vst [vmem:[#allocation10] sm:$0xff] %v474_v56  ;;  %v621_v59 = vpop.f32.mrb[7].mxu1 }
 0x3d3   :  { %760 = shalt.err (!%p757_p8)
}
 0x3d4   :  { %s761_s6 = scalar_lea.hbm %s940_s7, 128 }
 0x3d5   :  { %p762_p9 = scmp.ne.s32.totalorder %s940_s7, %s761_s6  ;;  %p765_p10 = scmp.lt.u32.totalorder %s761_s6, %s940_s7 }
 0x3d7   :  { %p767_p11 = pnand %p765_p10, %p762_p9 }
 0x3d9   :  { %770 = shalt.err (!%p767_p11)
}
 0x3da   :  { %489 = dma.vmem_to_hbm [thread:$0]  %s487_s9, 128, %s940_s7, [#allocation4]  }
 0x3db   :  { %777 = dma.done.wait [#allocation4], 128  }
 0x3dc   :  { %778 = vsyncadd [#allocation4], 4294967168 }
 0x3dd   :  { %493 = vsyncpa [#allocation3], 1 }
 0x3de   :  { %494 = vsyncpa [#allocation6], 1 }
 0x3df   :  { %495 = vsyncpa [#allocation9], 1 }
 0x3e0   :  { %496 = vsyncpa [#allocation4], 1 }

</bundles_post_ra>
